<compile_context>
chip_gen: v7x
topology: tpu7x:2x2x1
jax: 0.10.0
libtpu: 0.0.40
codegen_flags: <defaults>
</compile_context>

<pallas_src>
from typing import Any, Callable, Optional

import jax
import jax.numpy as jnp
from jax.experimental import pallas as pl
from jax.experimental.pallas import tpu as pltpu

_LANES = 128
_DEFAULT_MAX_BLOCK_ROWS = 2048  # (2048, 128) f32 block = 1 MiB per input per step


def _sublane_multiple(dtype) -> int:
    """Row-block granularity so (rows, 128) blocks respect native TPU tiling."""
    itemsize = jnp.dtype(dtype).itemsize
    if itemsize >= 4:
        return 8
    if itemsize == 2:
        return 16
    return 32


def _make_mse_kernel(rows: int, block_rows: int, steps_per_shard: int, needs_mask: bool):
    """Build the sum-of-squared-differences kernel.

    rows            : true number of valid 128-lane rows (compile-time const)
    block_rows      : rows per grid step (multiple of 8)
    steps_per_shard : inner ("arbitrary") grid extent per shard
    needs_mask      : whether ragged/clamped blocks require an in-kernel row mask
    """

    def kernel(x_ref, y_ref, o_ref):
        c = pl.program_id(0)  # shard (parallel axis — TensorCores on v7x)
        i = pl.program_id(1)  # reduction step within the shard

        @pl.when(i == 0)
        def _init():
            o_ref[...] = jnp.zeros_like(o_ref)

        # Cast in-kernel: HBM traffic stays in the native (possibly 16-bit) dtype.
        d = x_ref[...].astype(jnp.float32) - y_ref[...].astype(jnp.float32)

        if needs_mask:
            # Mask rows beyond the true extent (stale rows of a partial last
            # block / duplicated block of the uneven shard split).  Uses the
            # UNCLAMPED block index so the phantom step contributes exactly 0.
            gblock = c * steps_per_shard + i
            row_ids = gblock * block_rows + jax.lax.broadcasted_iota(
                jnp.int32, (block_rows, _LANES), 0
            )
            d = jnp.where(row_ids < rows, d, 0.0)

        sq = d * d
        # Fold sublane-groups of 8 rows into the vreg-resident (8, 128)
        # accumulator (layout-preserving reshape + VPU adds only).
        o_ref[...] += jnp.sum(sq.reshape(block_rows // 8, 8, _LANES), axis=0)

    return kernel


def pallas_mse(
    pred: jax.Array, target: jax.Array, *, max_block_rows: int = _DEFAULT_MAX_BLOCK_ROWS
) -> jax.Array:
    """Mean squared error computed by a Pallas TPU kernel. Returns a scalar f32."""
    assert pred.shape == target.shape, "prediction/target shape mismatch"
    n = int(pred.size)
    assert n > 0, "empty input"

    x = pred.reshape(-1)
    y = target.reshape(-1)

    sub = max(_sublane_multiple(x.dtype), _sublane_multiple(y.dtype))

    # Pad only to a single 128-lane row (and, for tiny inputs, to one full
    # native sublane-group of rows).  Zero padding contributes 0 to the sum.
    n_pad = max(pl.cdiv(n, _LANES) * _LANES, sub * _LANES)
    if n_pad != n:
        x = jnp.pad(x, (0, n_pad - n))
        y = jnp.pad(y, (0, n_pad - n))

    rows = n_pad // _LANES  # >= sub by construction
    x2d = x.reshape(rows, _LANES)  # free, layout-preserving reshape
    y2d = y.reshape(rows, _LANES)

    # Row block: multiple of the native sublane group, capped by max_block_rows
    # and by the (rounded-down) row count; ragged tails are masked in-kernel.
    mbr = max(sub, (int(max_block_rows) // sub) * sub)
    block_rows = max(sub, min(mbr, (rows // sub) * sub))
    steps = pl.cdiv(rows, block_rows)

    # Split the reduction into 2 shards on a leading "parallel" axis so v7x's
    # two TensorCores each stream half the data; harmless on v5e/v6e.
    num_shards = 2 if steps >= 2 else 1
    spc = pl.cdiv(steps, num_shards)

    partial_last = (rows % block_rows) != 0
    needs_clamp = (spc * num_shards) != steps
    needs_mask = partial_last or needs_clamp

    if needs_clamp:
        # Clamp the block index for the phantom trailing step of the uneven
        # shard split; the duplicated block is fully masked out in-kernel.
        def idx_map(c, i):
            return (jnp.minimum(c * spc + i, steps - 1), 0)
    else:
        def idx_map(c, i):
            return (c * spc + i, 0)

    kernel = _make_mse_kernel(rows, block_rows, spc, needs_mask)

    # Per-shard (8, 128) partial-sum slabs; the output block is resident across
    # the reduction axis and acts as the accumulator (no scratch needed).
    partials = pl.pallas_call(
        kernel,
        out_shape=jax.ShapeDtypeStruct((num_shards * 8, _LANES), jnp.float32),
        grid=(num_shards, spc),
        in_specs=[
            pl.BlockSpec((block_rows, _LANES), idx_map),
            pl.BlockSpec((block_rows, _LANES), idx_map),
        ],
        out_specs=pl.BlockSpec((8, _LANES), lambda c, i: (c, 0)),
        compiler_params=pltpu.CompilerParams(
            dimension_semantics=("parallel", "arbitrary"),
        ),
    )(x2d, y2d)

    # Tiny final reduce + mean; 1/n baked as a Python (double-precision) const.
    return jnp.sum(partials) * (1.0 / n)


# ---------------------------------------------------------------------------
# Metric / _WrappedMetric semantics (JAX re-implementation of torchmanager)
# ---------------------------------------------------------------------------
class Metric:
    """JAX port of torchmanager Metric bookkeeping."""

    def __init__(
        self,
        metric_fn: Optional[Callable[[Any, Any], jax.Array]] = None,
        target: Optional[str] = None,
    ) -> None:
        self._metric_fn = metric_fn
        self._results: list[jax.Array] = []
        self._target = target

    @property
    def result(self) -> jax.Array:
        if len(self._results) > 0:
            return jnp.concatenate(self._results).mean()
        return jnp.array(jnp.nan)

    @property
    def results(self) -> Optional[jax.Array]:
        if len(self._results) > 0:
            return jnp.concatenate(self._results)
        return None

    def __call__(self, input: Any, target: Any) -> jax.Array:
        if self._target is not None:
            assert isinstance(input, dict) and isinstance(target, dict), TypeError(
                f"Given input or target must be dictionaries, got {type(input)} and {type(target)}."
            )
            assert self._target in input and self._target in target, TypeError(
                f"Target '{self._target}' cannot be found in input or target"
            )
            input, target = input[self._target], target[self._target]
        m = self.forward(input, target)
        # `.unsqueeze(0).cpu().detach()` analogue: stop-gradient + leading dim.
        # TODO(synk): no device->host .cpu() transfer analogue; result stays on TPU.
        self._results.append(jax.lax.stop_gradient(m)[None])
        return m

    def forward(self, input: Any, target: Any) -> jax.Array:
        if self._metric_fn is not None:
            return self._metric_fn(input, target)
        raise NotImplementedError("metric_fn is not given.")

    def reset(self) -> None:
        self._results.clear()


class _WrappedMetric(Metric):
    @property
    def wrapped_metric_fn(self) -> Callable[[Any, Any], jax.Array]:
        assert self._metric_fn is not None, AttributeError("Metric function is not given.")
        return self._metric_fn

    def __init__(
        self,
        metric_fn: Callable[[Any, Any], jax.Array],
        target: Optional[str] = None,
    ) -> None:
        super().__init__(metric_fn, target)

    def forward(self, input: Any, target: Any) -> jax.Array:
        # @torch.no_grad() analogue
        return jax.lax.stop_gradient(self.wrapped_metric_fn(input, target))


def metric_fn(target: Optional[str] = None):
    """Decorator that wraps a (pred, target) -> scalar function into _WrappedMetric."""

    def wrapped_fn(fn_to_wrap: Callable[[Any, Any], jax.Array]) -> _WrappedMetric:
        return _WrappedMetric(fn_to_wrap, target=target)

    return wrapped_fn


if __name__ == "__main__":
    key = jax.random.PRNGKey(0)
    k1, k2, k3, k4, k5, k6, k7, k8 = jax.random.split(key, 8)

    # layout: NCHW, small shapes — batch=2, channels=4, spatial=16x16
    x = jax.random.normal(k1, (2, 4, 16, 16), dtype=jnp.float32)
    y = jax.random.normal(k2, (2, 4, 16, 16), dtype=jnp.float32)

    # Build the wrapped metric via the decorator with dict-target routing.
    @metric_fn(target="out")
    def mse_metric(pred: Any, tgt: Any) -> jax.Array:
        return pallas_mse(pred, tgt)

    m = jax.block_until_ready(mse_metric({"out": x}, {"out": y}))
    ref = jnp.mean((x - y) ** 2)
    assert jnp.allclose(m, ref, rtol=1e-5, atol=1e-6), (m, ref)

    # Exercise the multi-step / two-shard / clamped+masked paths at small size
    # by capping the row block.  5*4*16*16 = 5120 elems -> 40 rows, blocks of 16
    # rows -> 3 steps split over 2 shards (odd -> clamp) with a partial tail.
    x2 = jax.random.normal(k3, (5, 4, 16, 16), dtype=jnp.float32)
    y2 = jax.random.normal(k4, (5, 4, 16, 16), dtype=jnp.float32)
    m2 = jax.block_until_ready(pallas_mse(x2, y2, max_block_rows=16))
    ref2 = jnp.mean((x2 - y2) ** 2)
    assert jnp.allclose(m2, ref2, rtol=1e-5, atol=1e-6), (m2, ref2)

    # bf16 inputs streamed natively (half the HBM bytes), cast to f32 in-kernel.
    xb = x.astype(jnp.bfloat16)
    yb = y.astype(jnp.bfloat16)
    m3 = jax.block_until_ready(pallas_mse(xb, yb))
    ref3 = jnp.mean((xb.astype(jnp.float32) - yb.astype(jnp.float32)) ** 2)
    assert jnp.allclose(m3, ref3, rtol=1e-5, atol=1e-6), (m3, ref3)

    # Size that is a multiple of 128 lanes but NOT of 1024: exercises the
    # new pad-free path with a partial (masked) last block.  2*5*8*16 = 1280.
    x4 = jax.random.normal(k5, (2, 5, 8, 16), dtype=jnp.float32)
    y4 = jax.random.normal(k6, (2, 5, 8, 16), dtype=jnp.float32)
    m4 = jax.block_until_ready(pallas_mse(x4, y4))
    ref4 = jnp.mean((x4 - y4) ** 2)
    assert jnp.allclose(m4, ref4, rtol=1e-5, atol=1e-6), (m4, ref4)

    # Ragged size (not a multiple of 128): exercises the rare pad fallback.
    x5 = jax.random.normal(k7, (3, 5, 7), dtype=jnp.float32)
    y5 = jax.random.normal(k8, (3, 5, 7), dtype=jnp.float32)
    m5 = jax.block_until_ready(pallas_mse(x5, y5))
    ref5 = jnp.mean((x5 - y5) ** 2)
    assert jnp.allclose(m5, ref5, rtol=1e-5, atol=1e-6), (m5, ref5)

    # Exercise the result-accumulation path too.
    _ = jax.block_until_ready(mse_metric.result)

    print("KERNEL_OK")
</pallas_src>

<mosaic_0001>
module attributes {stable_mosaic.version = 11 : i64} {
  func.func @kernel(%arg0: i32, %arg1: i32, %arg2: memref<16x128xf32, #tpu.memory_space<vmem>>, %arg3: memref<16x128xf32, #tpu.memory_space<vmem>>, %arg4: memref<8x128xf32, #tpu.memory_space<vmem>>) attributes {dimension_semantics = [#tpu.dimension_semantics<parallel>, #tpu.dimension_semantics<arbitrary>], iteration_bounds = array<i64: 1, 1>, scalar_prefetch = 0 : i64, scratch_operands = 0 : i64, tpu.core_type = #tpu.core_type<tc>, window_params = [{transform_indices = @transform_0, window_bounds = array<i64: 16, 128>}, {transform_indices = @transform_1, window_bounds = array<i64: 16, 128>}, {transform_indices = @transform_2, window_bounds = array<i64: 8, 128>}]} {
    %c0_i32 = arith.constant 0 : i32
    %0 = arith.cmpi eq, %arg1, %c0_i32 : i32
    %1 = arith.extui %0 : i1 to i32
    %c0_i32_0 = arith.constant 0 : i32
    %2 = arith.cmpi ne, %1, %c0_i32_0 : i32
    scf.if %2 {
      %cst_8 = arith.constant 0.000000e+00 : f32
      %12 = vector.broadcast %cst_8 : f32 to vector<8x128xf32>
      %c0_9 = arith.constant 0 : index
      %c0_10 = arith.constant 0 : index
      %13 = vector.load %arg4[%c0_9, %c0_10] : memref<8x128xf32, #tpu.memory_space<vmem>>, vector<8x128xf32>
      tpu.vector_store %arg4[%c0_9, %c0_10], %12 {strides = array<i32>} : memref<8x128xf32, #tpu.memory_space<vmem>>, vector<8x128xf32>,
    } else {
    }
    %c0 = arith.constant 0 : index
    %c0_1 = arith.constant 0 : index
    %3 = vector.load %arg2[%c0, %c0_1] : memref<16x128xf32, #tpu.memory_space<vmem>>, vector<16x128xf32>
    %c0_2 = arith.constant 0 : index
    %c0_3 = arith.constant 0 : index
    %4 = vector.load %arg3[%c0_2, %c0_3] : memref<16x128xf32, #tpu.memory_space<vmem>>, vector<16x128xf32>
    %5 = arith.subf %3, %4 : vector<16x128xf32>
    %6 = arith.mulf %5, %5 : vector<16x128xf32>
    %c0_4 = arith.constant 0 : index
    %c0_5 = arith.constant 0 : index
    %7 = vector.load %arg4[%c0_4, %c0_5] : memref<8x128xf32, #tpu.memory_space<vmem>>, vector<8x128xf32>
    %8 = vector.shape_cast %6 : vector<16x128xf32> to vector<2x8x128xf32>
    %cst = arith.constant dense<0.000000e+00> : vector<8x128xf32>
    %9 = vector.multi_reduction <add>, %8, %cst [0] : vector<2x8x128xf32> to vector<8x128xf32>
    %10 = arith.addf %7, %9 : vector<8x128xf32>
    %c0_6 = arith.constant 0 : index
    %c0_7 = arith.constant 0 : index
    %11 = vector.load %arg4[%c0_6, %c0_7] : memref<8x128xf32, #tpu.memory_space<vmem>>, vector<8x128xf32>
    tpu.vector_store %arg4[%c0_6, %c0_7], %10 {strides = array<i32>} : memref<8x128xf32, #tpu.memory_space<vmem>>, vector<8x128xf32>,
    return
  }
  func.func @transform_0(%arg0: i32, %arg1: i32) -> (i32, i32) {
    %c1_i32 = arith.constant 1 : i32
    %0 = arith.muli %arg0, %c1_i32 : i32
    %1 = arith.addi %0, %arg1 : i32
    %c0_i32 = arith.constant 0 : i32
    %c0_i32_0 = arith.constant 0 : i32
    return %1, %c0_i32 : i32, i32
  }
  func.func @transform_1(%arg0: i32, %arg1: i32) -> (i32, i32) {
    %c1_i32 = arith.constant 1 : i32
    %0 = arith.muli %arg0, %c1_i32 : i32
    %1 = arith.addi %0, %arg1 : i32
    %c0_i32 = arith.constant 0 : i32
    %c0_i32_0 = arith.constant 0 : i32
    return %1, %c0_i32 : i32, i32
  }
  func.func @transform_2(%arg0: i32, %arg1: i32) -> (i32, i32) {
    %c0_i32 = arith.constant 0 : i32
    %c0_i32_0 = arith.constant 0 : i32
    return %arg0, %c0_i32 : i32, i32
  }
}

</mosaic_0001>

<bundles_post_ra>
// kernel: tpu_custom_call.1
= control target key start
LH: loop header
LB: loop body
LE: loop exit
PB: predicated region body
PF: predicated region fallthrough
CT: control target
= control target key end

     0   :  { %7 = vsyncpa [#allocation3], 0  ;;  %s219_s0 = inlined_call_operand.hbm [shape: f32[16,128], index: 0, kind: input, shape index: {}]   ;;  %s220_s1 = inlined_call_operand.hbm [shape: f32[16,128], index: 1, kind: input, shape index: {}]   ;;  %s221_s2 = inlined_call_operand.hbm [shape: f32[8,128], index: 2, kind: output, shape index: {}]  }
   0x1   :  { %8 = vsyncpa [#allocation6], 0 }
   0x2   :  { %9 = vsyncpa [#allocation4], 0  ;;  %s163_s9 = smov [#allocation2]   ;;  %s91_s13 = scalar_lea.hbm %s219_s0, 256 }
   0x3   :  { %s19_s10 = sshll.u32 %s163_s9, 4  ;;  %p92_p0 = scmp.ne.s32.totalorder %s219_s0, %s91_s13  ;;  %s20_s10 = int_to_ptr.vmem [resolvable:$true] %s19_s10 }
   0x4   :  { %p95_p1 = scmp.lt.u32.totalorder %s91_s13, %s219_s0 }
   0x6   :  { %p97_p2 = pnand %p95_p1, %p92_p0 }
   0x8   :  { %100 = shalt.err (!%p97_p2)
}
   0x9   :  { %s101_s18 = scalar_lea.vmem %s20_s10, 256  ;;  %p106_p4 = scmp.lt.s32.totalorder %s20_s10, %s20_s10 }
   0xa   :  { %p102_p3 = scmp.ne.s32.totalorder %s20_s10, %s101_s18  ;;  %p107_p5 = scmp.lt.s32.totalorder %s101_s18, %s101_s18 }
   0xc   :  { %p108_p6 = por %p107_p5, %p106_p4 }
   0xe   :  { %p109_p7 = pnand %p108_p6, %p102_p3 }
  0x10   :  { %112 = shalt.err (!%p109_p7)
}
  0x11   :  { %s164_s19 = smov 128   ;;  %s165_s20 = smov 8  }
  0x12   :  { %25 = dma.hbm_to_vmem [thread:$0]  %s219_s0, 256, %s20_s10, [#allocation3], %s164_s19, %s164_s19, %s165_s20  }
  0x13   :  { %s166_s23 = smov [#allocation5]   ;;  %s113_s27 = scalar_lea.hbm %s220_s1, 256 }
  0x14   :  { %s35_s24 = sshll.u32 %s166_s23, 4  ;;  %p114_p8 = scmp.ne.s32.totalorder %s220_s1, %s113_s27  ;;  %s36_s24 = int_to_ptr.vmem [resolvable:$true] %s35_s24 }
  0x15   :  { %p117_p9 = scmp.lt.u32.totalorder %s113_s27, %s220_s1 }
  0x17   :  { %p119_p10 = pnand %p117_p9, %p114_p8 }
  0x19   :  { %122 = shalt.err (!%p119_p10)
}
  0x1a   :  { %s123_s4 = scalar_lea.vmem %s36_s24, 256  ;;  %p128_p12 = scmp.lt.s32.totalorder %s36_s24, %s36_s24 }
  0x1b   :  { %p124_p11 = scmp.ne.s32.totalorder %s36_s24, %s123_s4  ;;  %p129_p13 = scmp.lt.s32.totalorder %s123_s4, %s123_s4 }
  0x1d   :  { %p130_p0 = por %p129_p13, %p128_p12 }
  0x1f   :  { %p131_p1 = pnand %p130_p0, %p124_p11 }
  0x21   :  { %134 = shalt.err (!%p131_p1)
}
  0x22   :  { %41 = dma.hbm_to_vmem [thread:$0]  %s220_s1, 256, %s36_s24, [#allocation6], %s164_s19, %s164_s19, %s165_s20  }
  0x23   :  { %157 = dma.done.wait [#allocation3], 256  }
  0x24   :  { %158 = vsyncadd [#allocation3], 4294967040 }
  0x25   :  { %159 = dma.done.wait [#allocation6], 256  }
  0x26   :  { %160 = vsyncadd [#allocation6], 4294967040  ;;  %v57_v0 = vld [vmem:[#allocation2] sm:$0xff]  ;;  %v58_v1 = vld [vmem:[#allocation2 + $0x8] sm:$0xff]  ;;  %s167_s6 = smov [#allocation7]  }
  0x27   :  { %v59_v2 = vld [vmem:[#allocation5] sm:$0xff]  ;;  %v60_v3 = vld [vmem:[#allocation5 + $0x8] sm:$0xff]  ;;  %s75_s7 = sshll.u32 %s167_s6, 4  ;;  %s76_s7 = int_to_ptr.vmem [resolvable:$true] %s75_s7 }
  0x28   :  { %v61_v4 = vsub.f32 %v57_v0, %v59_v2  ;;  %v62_v5 = vsub.f32 %v58_v1, %v60_v3  ;;  %s135_s8 = scalar_lea.vmem %s76_s7, 128  ;;  %p140_p3 = scmp.lt.s32.totalorder %s76_s7, %s76_s7 }
  0x29   :  { %p136_p2 = scmp.ne.s32.totalorder %s76_s7, %s135_s8  ;;  %p141_p4 = scmp.lt.s32.totalorder %s135_s8, %s135_s8 }
  0x2a   :  { %v63_v6 = vmul.f32 %v61_v4, %v61_v4  ;;  %v64_v7 = vmul.f32 %v62_v5, %v62_v5 }
  0x2b   :  { %p142_p5 = por %p141_p4, %p140_p3 }
  0x2c   :  { %v66_v8 = vadd.f32 %v64_v7, %v63_v6 }
  0x2d   :  { %p143_p6 = pnand %p142_p5, %p136_p2 }
  0x2e   :  { %68 = vst [vmem:[#allocation7] sm:$0xff] %v66_v8 }
  0x2f   :  { %146 = shalt.err (!%p143_p6)
}
  0x30   :  { %s147_s10 = scalar_lea.hbm %s221_s2, 128 }
  0x31   :  { %p148_p7 = scmp.ne.s32.totalorder %s221_s2, %s147_s10  ;;  %p151_p8 = scmp.lt.u32.totalorder %s147_s10, %s221_s2 }
  0x33   :  { %p153_p9 = pnand %p151_p8, %p148_p7 }
  0x35   :  { %156 = shalt.err (!%p153_p9)
}
  0x36   :  { %78 = dma.vmem_to_hbm [thread:$0]  %s76_s7, 128, %s221_s2, [#allocation4]  }
  0x37   :  { %161 = dma.done.wait [#allocation4], 128  }
  0x38   :  { %162 = vsyncadd [#allocation4], 4294967168 }
  0x39   :  { %82 = vsyncpa [#allocation3], 1 }
  0x3a   :  { %83 = vsyncpa [#allocation6], 1 }
  0x3b   :  { %84 = vsyncpa [#allocation4], 1 }

</bundles_post_ra>
